<compile_context>
chip_gen: v7x
topology: tpu7x:2x2x1
jax: 0.10.0
libtpu: 0.0.40
codegen_flags: <defaults>
</compile_context>

<pallas_src>
import functools

import jax
import jax.numpy as jnp
from jax.experimental import pallas as pl
from jax.experimental.pallas import tpu as pltpu


def _switch_kernel(q_ref, wT_ref, thresh_ref, scores_ref, packed_ref, out_ref,
                   *, default_packed):
    # q: (TB, F) bf16 bit-array; wT: (F, K) bf16 with entries in {-1, 0, +1}.
    logits = jnp.dot(q_ref[...], wT_ref[...],
                     preferred_element_type=jnp.float32)            # (TB, K) f32, exact
    match = logits == thresh_ref[...]                               # == (out == in_fea)
    masked_scores = jnp.where(match, scores_ref[...], jnp.float32(0.0))  # == mask * scores
    index = jnp.argmax(masked_scores, axis=-1).astype(jnp.int32)    # first-max, like torch

    TB, K = logits.shape
    iota = jax.lax.broadcasted_iota(jnp.int32, (TB, K), 1)
    onehot = iota == index[:, None]
    # Single one-hot reduce gathers (values[idx] << 16) | idx in one pass.
    packed = jnp.sum(jnp.where(onehot, packed_ref[...], jnp.int32(0)), axis=-1)
    any_match = jnp.any(match, axis=-1)
    packed = jnp.where(any_match, packed, jnp.int32(default_packed))
    out_ref[...] = packed[None, :]                                  # (1, TB) lane-dense store


class SwitchPallas:
    """JAX/Pallas port of the torch Switch module (values stored as int32)."""

    def __init__(self, in_fea, keys, mask, values, scores, num_classes=2):
        keys = jnp.asarray(keys, jnp.float32)                       # (K, F)
        masks = jnp.abs(jnp.asarray(mask, jnp.float32) - 1.0)       # (K, F), 1 = don't-care
        self.values = jnp.asarray(values, jnp.int32)                # (K,) small non-negative classes
        self.scores = jnp.asarray(scores, jnp.float32)              # (K,)
        self.in_fea = float(in_fea)
        self.num_keys = int(keys.shape[0])
        self.default_value = 0
        # torch quirk: forward uses len(self.scores) where self.scores is the
        # registered (1, K) buffer, so len(...) == 1.  Reproduced literally.
        self.default_index = 1

        # Parameter setup hoisted out of __call__: fold XNOR + don't-care-OR +
        # sum into q @ wT, and fold the per-key bias into the threshold.
        one_minus_m = 1.0 - masks
        self.wT = jnp.transpose(one_minus_m * (2.0 * keys - 1.0)).astype(jnp.bfloat16)  # (F, K)
        c = jnp.sum(one_minus_m * (1.0 - keys) + masks, axis=-1)                        # (K,)
        self.thresh = (self.in_fea - c)[None, :].astype(jnp.float32)                    # (1, K)
        self.packed_vals = self._pack_vals(self.values)                                 # (1, K)
        self.default_packed = (self.default_value << 16) | self.default_index

    @staticmethod
    def _pack_vals(values):
        k = values.shape[0]
        return ((values.astype(jnp.int32) << 16)
                | jnp.arange(k, dtype=jnp.int32))[None, :]

    def __call__(self, query, label=None, num_drop=0, cache=False,
                 return_key=False, tile_b=1024):
        # TODO(synk): cache=True appends host-side numpy samples to python lists
        # (self.allocate_samples); host side effect, no Pallas equivalent.
        query = jnp.asarray(query, jnp.float32)
        B, F = query.shape

        if num_drop == 0:
            wT, thresh = self.wT, self.thresh
            scores2d, packed = self.scores[None, :], self.packed_vals
        else:
            if num_drop >= self.num_keys:
                raise ValueError("num_drop removes every key; argmax would be empty")
            wT = self.wT[:, num_drop:]
            thresh = self.thresh[:, num_drop:]
            scores2d = self.scores[None, num_drop:]
            packed = self._pack_vals(self.values[num_drop:])  # indices relative to slice
        K = wT.shape[1]

        # Batch tiling: small batches run as a single full-extent block; large
        # batches are tiled at tile_b rows (multiple of 8 sublanes and of 128
        # lanes for the lane-dense packed output), giving automatic
        # double-buffering of the streamed query tiles.
        if B > tile_b:
            assert tile_b % 128 == 0, "multi-tile batch tile must be lane aligned"
            grid_b = -(-B // tile_b)
            padded_B = grid_b * tile_b
        else:
            tile_b = B
            grid_b = 1
            padded_B = B

        q = query.astype(jnp.bfloat16)          # 0/1 bits exact in bf16, halves HBM traffic
        if padded_B != B:
            q = jnp.pad(q, ((0, padded_B - B), (0, 0)))

        kernel = functools.partial(_switch_kernel,
                                   default_packed=self.default_packed)

        cost = pl.CostEstimate(
            flops=2 * padded_B * F * K,
            transcendentals=0,
            bytes_accessed=(padded_B * F * 2 + F * K * 2 + 3 * K * 4 + padded_B * 4),
        )

        packed_out = pl.pallas_call(
            kernel,
            grid=(grid_b,),
            in_specs=[
                pl.BlockSpec((tile_b, F), lambda i: (i, 0)),   # query  (streamed per tile)
                pl.BlockSpec((F, K), lambda i: (0, 0)),        # wT     (resident)
                pl.BlockSpec((1, K), lambda i: (0, 0)),        # thresh (resident)
                pl.BlockSpec((1, K), lambda i: (0, 0)),        # scores (resident)
                pl.BlockSpec((1, K), lambda i: (0, 0)),        # packed values|iota (resident)
            ],
            out_specs=pl.BlockSpec((1, tile_b), lambda i: (0, i)),
            out_shape=jax.ShapeDtypeStruct((1, padded_B), jnp.int32),
            compiler_params=pltpu.CompilerParams(
                dimension_semantics=("parallel",)),
            cost_estimate=cost,
        )(q, wT, thresh, scores2d, packed)

        packed_out = packed_out[0, :B]
        pred = (packed_out >> 16).astype(jnp.int32)     # class values are small, non-negative
        index = (packed_out & 0xFFFF).astype(jnp.int32)
        if return_key:
            return pred, index
        return pred


def _switch_ref(query, keys, masks, values, scores, in_fea, default_value, default_index):
    """Plain-JAX transcription of the torch forward for correctness checking."""
    q = query[:, None, :]
    out = 1.0 - (q + keys[None] - 2.0 * q * keys[None])
    out = out + masks[None] - out * masks[None]
    out = out.sum(-1)                                                   # (B, K)
    match = out == in_fea
    index = jnp.argmax(match * scores[None, :], axis=-1).astype(jnp.int32)
    pred = values[index]
    any_match = jnp.sum(match, axis=-1) != 0
    pred = jnp.where(any_match, pred, default_value).astype(jnp.int32)
    index = jnp.where(any_match, index, default_index).astype(jnp.int32)
    return pred, index


if __name__ == "__main__":
    B, F, K, NUM_CLASSES = 8, 16, 8, 2

    root = jax.random.PRNGKey(0)
    k_q, k_keys, k_mask, k_vals, k_q2 = jax.random.split(root, 5)

    query = jax.random.bernoulli(k_q, 0.5, (B, F)).astype(jnp.float32)
    keys = jax.random.bernoulli(k_keys, 0.5, (K, F)).astype(jnp.float32)
    mask = jax.random.bernoulli(k_mask, 0.7, (K, F)).astype(jnp.float32)  # 1 = care bit
    values = jax.random.randint(k_vals, (K,), 0, NUM_CLASSES, dtype=jnp.int32)
    scores = jnp.arange(K, 0, -1, dtype=jnp.float32)                     # distinct priorities

    # Guarantee at least one exact match: key 0 := query row 0, all bits cared.
    keys = keys.at[0].set(query[0])
    mask = mask.at[0].set(1.0)

    switch = SwitchPallas(F, keys, mask, values, scores, num_classes=NUM_CLASSES)
    masks = jnp.abs(mask - 1.0)

    # --- Test 1: small batch, single full-extent tile -----------------------
    pred, index = switch(query, return_key=True)
    jax.block_until_ready((pred, index))
    pred_ref, index_ref = _switch_ref(
        query, keys, masks, values, scores,
        in_fea=float(F), default_value=switch.default_value,
        default_index=switch.default_index)
    assert pred.shape == (B,) and index.shape == (B,)
    assert jnp.array_equal(pred, pred_ref), (pred, pred_ref)
    assert jnp.array_equal(index, index_ref), (index, index_ref)

    # --- Test 2: batch > tile -> multi-tile grid with padding ---------------
    B2 = 200
    query2 = jax.random.bernoulli(k_q2, 0.5, (B2, F)).astype(jnp.float32)
    query2 = query2.at[7].set(keys[0])                                   # force one exact match
    pred2, index2 = switch(query2, return_key=True, tile_b=128)
    jax.block_until_ready((pred2, index2))
    pred2_ref, index2_ref = _switch_ref(
        query2, keys, masks, values, scores,
        in_fea=float(F), default_value=switch.default_value,
        default_index=switch.default_index)
    assert pred2.shape == (B2,) and index2.shape == (B2,)
    assert jnp.array_equal(pred2, pred2_ref), (pred2, pred2_ref)
    assert jnp.array_equal(index2, index2_ref), (index2, index2_ref)

    print("KERNEL_OK")
</pallas_src>

<mosaic_0001>
module attributes {stable_mosaic.version = 11 : i64} {
  func.func @_switch_kernel(%arg0: i32, %arg1: memref<8x16xbf16, #tpu.memory_space<vmem>>, %arg2: memref<16x8xbf16, #tpu.memory_space<vmem>>, %arg3: memref<1x8xf32, #tpu.memory_space<vmem>>, %arg4: memref<1x8xf32, #tpu.memory_space<vmem>>, %arg5: memref<1x8xi32, #tpu.memory_space<vmem>>, %arg6: memref<1x8xi32, #tpu.memory_space<vmem>>) attributes {dimension_semantics = [#tpu.dimension_semantics<parallel>], iteration_bounds = array<i64: 1>, scalar_prefetch = 0 : i64, scratch_operands = 0 : i64, tpu.core_type = #tpu.core_type<tc>, window_params = [{transform_indices = @transform_0, window_bounds = array<i64: 8, 16>}, {pipeline_mode = #tpu.pipeline_mode<synchronous>, transform_indices = @transform_1, window_bounds = array<i64: 16, 8>}, {pipeline_mode = #tpu.pipeline_mode<synchronous>, transform_indices = @transform_2, window_bounds = array<i64: 1, 8>}, {pipeline_mode = #tpu.pipeline_mode<synchronous>, transform_indices = @transform_3, window_bounds = array<i64: 1, 8>}, {pipeline_mode = #tpu.pipeline_mode<synchronous>, transform_indices = @transform_4, window_bounds = array<i64: 1, 8>}, {transform_indices = @transform_5, window_bounds = array<i64: 1, 8>}]} {
    %c0 = arith.constant 0 : index
    %c0_0 = arith.constant 0 : index
    %0 = vector.load %arg1[%c0, %c0_0] : memref<8x16xbf16, #tpu.memory_space<vmem>>, vector<8x16xbf16>
    %c0_1 = arith.constant 0 : index
    %c0_2 = arith.constant 0 : index
    %1 = vector.load %arg2[%c0_1, %c0_2] : memref<16x8xbf16, #tpu.memory_space<vmem>>, vector<16x8xbf16>
    %cst = arith.constant dense<0.000000e+00> : vector<8x8xf32>
    %2 = tpu.matmul %0, %1, %cst {dimension_numbers = #tpu.dot_dimension_numbers<[1], [0], [0], [1], [0, 0, 1, 1], [], []>} : vector<8x16xbf16>, vector<16x8xbf16>, vector<8x8xf32> -> vector<8x8xf32>
    %c0_3 = arith.constant 0 : index
    %c0_4 = arith.constant 0 : index
    %3 = vector.load %arg3[%c0_3, %c0_4] : memref<1x8xf32, #tpu.memory_space<vmem>>, vector<1x8xf32>
    %4 = vector.broadcast %3 : vector<1x8xf32> to vector<8x8xf32>
    %5 = arith.cmpf oeq, %2, %4 : vector<8x8xf32>
    %c0_5 = arith.constant 0 : index
    %c0_6 = arith.constant 0 : index
    %6 = vector.load %arg4[%c0_5, %c0_6] : memref<1x8xf32, #tpu.memory_space<vmem>>, vector<1x8xf32>
    %cst_7 = arith.constant 0.000000e+00 : f32
    %7 = vector.shape_cast %6 : vector<1x8xf32> to vector<1x8xf32>
    %8 = vector.broadcast %7 : vector<1x8xf32> to vector<8x8xf32>
    %9 = vector.broadcast %cst_7 : f32 to vector<8x8xf32>
    %10 = arith.select %5, %8, %9 : vector<8x8xi1>, vector<8x8xf32>
    %11 = tpu.reduce_index %10 {axis = 1 : i32, kind = #tpu.reduction_kind<arg_max>} : vector<8x8xf32> -> vector<8xi32>
    %12 = tpu.iota {dimensions = array<i32: 1>} : vector<8x8xi32>
    %13 = vector.shape_cast %11 : vector<8xi32> to vector<8x1xi32>
    %14 = vector.broadcast %13 : vector<8x1xi32> to vector<8x8xi32>
    %15 = arith.cmpi eq, %12, %14 : vector<8x8xi32>
    %c0_8 = arith.constant 0 : index
    %c0_9 = arith.constant 0 : index
    %16 = vector.load %arg5[%c0_8, %c0_9] : memref<1x8xi32, #tpu.memory_space<vmem>>, vector<1x8xi32>
    %c0_i32 = arith.constant 0 : i32
    %17 = vector.shape_cast %16 : vector<1x8xi32> to vector<1x8xi32>
    %18 = vector.broadcast %17 : vector<1x8xi32> to vector<8x8xi32>
    %19 = vector.broadcast %c0_i32 : i32 to vector<8x8xi32>
    %20 = arith.select %15, %18, %19 : vector<8x8xi1>, vector<8x8xi32>
    %cst_10 = arith.constant dense<0> : vector<8xi32>
    %21 = vector.multi_reduction <add>, %20, %cst_10 [1] : vector<8x8xi32> to vector<8xi32>
    %cst_11 = arith.constant 1.000000e+00 : f32
    %cst_12 = arith.constant 0.000000e+00 : f32
    %22 = vector.broadcast %cst_11 : f32 to vector<8x8xf32>
    %23 = vector.broadcast %cst_12 : f32 to vector<8x8xf32>
    %24 = arith.select %5, %22, %23 : vector<8x8xi1>, vector<8x8xf32>
    %cst_13 = arith.constant dense<0xFF800000> : vector<8xf32>
    %25 = vector.multi_reduction <maximumf>, %24, %cst_13 [1] : vector<8x8xf32> to vector<8xf32>
    %cst_14 = arith.constant 0.000000e+00 : f32
    %26 = vector.broadcast %cst_14 : f32 to vector<8xf32>
    %27 = arith.cmpf ogt, %25, %26 : vector<8xf32>
    %c1_i32 = arith.constant 1 : i32
    %28 = vector.broadcast %c1_i32 : i32 to vector<8xi32>
    %29 = arith.select %27, %21, %28 : vector<8xi1>, vector<8xi32>
    %30 = vector.shape_cast %29 : vector<8xi32> to vector<1x8xi32>
    %c0_15 = arith.constant 0 : index
    %c0_16 = arith.constant 0 : index
    %31 = vector.load %arg6[%c0_15, %c0_16] : memref<1x8xi32, #tpu.memory_space<vmem>>, vector<1x8xi32>
    tpu.vector_store %arg6[%c0_15, %c0_16], %30 {strides = array<i32>} : memref<1x8xi32, #tpu.memory_space<vmem>>, vector<1x8xi32>,
    return
  }
  func.func @transform_0(%arg0: i32) -> (i32, i32) {
    %c0_i32 = arith.constant 0 : i32
    %c0_i32_0 = arith.constant 0 : i32
    return %arg0, %c0_i32 : i32, i32
  }
  func.func @transform_1(%arg0: i32) -> (i32, i32) {
    %c0_i32 = arith.constant 0 : i32
    %c0_i32_0 = arith.constant 0 : i32
    %c0_i32_1 = arith.constant 0 : i32
    return %c0_i32, %c0_i32_0 : i32, i32
  }
  func.func @transform_2(%arg0: i32) -> (i32, i32) {
    %c0_i32 = arith.constant 0 : i32
    %c0_i32_0 = arith.constant 0 : i32
    %c0_i32_1 = arith.constant 0 : i32
    return %c0_i32, %c0_i32_0 : i32, i32
  }
  func.func @transform_3(%arg0: i32) -> (i32, i32) {
    %c0_i32 = arith.constant 0 : i32
    %c0_i32_0 = arith.constant 0 : i32
    %c0_i32_1 = arith.constant 0 : i32
    return %c0_i32, %c0_i32_0 : i32, i32
  }
  func.func @transform_4(%arg0: i32) -> (i32, i32) {
    %c0_i32 = arith.constant 0 : i32
    %c0_i32_0 = arith.constant 0 : i32
    %c0_i32_1 = arith.constant 0 : i32
    return %c0_i32, %c0_i32_0 : i32, i32
  }
  func.func @transform_5(%arg0: i32) -> (i32, i32) {
    %c0_i32 = arith.constant 0 : i32
    %c0_i32_0 = arith.constant 0 : i32
    return %c0_i32, %arg0 : i32, i32
  }
}

</mosaic_0001>

<bundles_post_ra>
// kernel: tpu_custom_call.1
= control target key start
LH: loop header
LB: loop body
LE: loop exit
PB: predicated region body
PF: predicated region fallthrough
CT: control target
= control target key end

     0   :  { %v184_v1 = vmov 0.0   ;;  %s249_s0 = inlined_call_operand.vmem [shape: bf16[8,16], index: 0, kind: input, shape index: {}]   ;;  %s250_s1 = inlined_call_operand.vmem [shape: bf16[16,8], index: 1, kind: input, shape index: {}]   ;;  %s251_s2 = inlined_call_operand.vmem [shape: f32[1,8], index: 2, kind: input, shape index: {}]   ;;  %s252_s3 = inlined_call_operand.vmem [shape: f32[1,8], index: 3, kind: input, shape index: {}]   ;;  %s253_s4 = inlined_call_operand.vmem [shape: s32[1,8], index: 4, kind: input, shape index: {}]   ;;  %s254_s5 = inlined_call_operand.hbm [shape: s32[1,8], index: 5, kind: output, shape index: {}]  }
   0x1   :  { %v159_v0 = vld [vmem:[%s250_s1] sm:$0xff]   ;;  %150 = vmatprep.subr.bf16.mxu0 %v184_v1 }
   0x2   :  { %10 = vsyncpa [#allocation3], 0  ;;  %151 = vmatpush3.bf16.msra.mxu0 %v159_v0  ;;  %vm185_vm0 = vmmov 0   ;;  %v22_v2 = vld [vmem:[%s249_s0] sm:$0xf]  ;;  %vm31_vm1 = vcmask 130048   ;;  %v95_v11 = vlaneseq }
   0x3   :  { %152 = vmatprep.mubr.msk.bf16.mxu0 %vm185_vm0, %v184_v1  ;;  %v145_v3 = vld [vmem:[%s251_s2] ss:$0 sm:$0xff]  ;;  %vm91_vm2 = vcmask 64512   ;;  %s186_s2 = smov [#allocation2]   ;;  %vm127_vm6 = vcmask 57344  }
   0x4   :  { %v146_v4 = vld [vmem:[%s252_s3] ss:$0 sm:$0xff]  ;;  %v96_v12 = vand.u32 127, %v95_v11  ;;  %v124_v25 = vshrl.u32 %v95_v11, 7  ;;  %s135_s3 = sshll.u32 %s186_s2, 4  ;;  %s136_s3 = int_to_ptr.vmem [resolvable:$true] %s135_s3 }
   0x5   :  { %153 = vmatmul.mubr.msk.bf16.vlgmr.msra.gmra.mrb[0].mxu0 %vm31_vm1, %v22_v2  ;;  %v147_v13 = vld [vmem:[%s253_s4] ss:$0 sm:$0xff]  ;;  %s160_s4 = scalar_lea.vmem %s136_s3, 16  ;;  %s164_s26 = scalar_lea.vmem %s136_s3, 32 }
   0x6   :  { %v125_v29 = vsub.s32 %v96_v12, %v124_v25  ;;  %p161_p0 = scmp.ne.s32.totalorder %s136_s3, %s160_s4  ;;  %p165_p1 = scmp.lt.s32.totalorder %s136_s3, %s136_s3 }
   0x7   :  { %p166_p2 = scmp.lt.s32.totalorder %s164_s26, %s160_s4 }
   0x9   :  { %p167_p3 = por %p166_p2, %p165_p1 }
   0xb   :  { %p168_p4 = pnand %p167_p3, %p161_p0 }
  0xd8   :  { %v69_v5 = vpop.f32.mrb[0].mxu0 }
  0xd9   :  { %vm82_vm3 = vcmp.eq.f32.partialorder %v69_v5, %v145_v3  ;;  %v154_v6 = vpop.f32.mrb[1].mxu0 }
  0xda   :  { %v72_v7 = vpop.f32.mrb[2].mxu0  ;;  %v90_v8 = vsel %vm82_vm3, %v146_v4, 0.0  ;;  %v117_v21 = vsel %vm82_vm3, 1.0, %v184_v1 }
  0xdb   :  { %v155_v9 = vpop.f32.mrb[3].mxu0  ;;  %v92_v10 = vsel %vm91_vm2, %v90_v8, -inf  ;;  %v118_v22 = vsel %vm91_vm2, %v117_v21, -inf }
  0xdc   :  { %93 = vmax.index.xlane.f32.xlu0 %v92_v10 }
 0x169   :  { %v94_v14 = vpop.xlane.xlu0 %93 }
 0x16a   :  { %vm97_vm4 = vcmp.eq.s32.totalorder %v96_v12, %v94_v14 }
 0x16b   :  { %v103_v15 = vsel %vm97_vm4, %v147_v13, 0 }
 0x16c   :  { %v104_v16 = vsel %vm91_vm2, %v103_v15, 0 }
 0x16d   :  { %v106_v17 = vshrl.u32 %v104_v16, 16  ;;  %v105_v18 = vand.u32 65535, %v104_v16 }
 0x16f   :  { %v108_v19 = vcvt.s32.f32 %v106_v17  ;;  %v107_v20 = vcvt.s32.f32 %v105_v18 }
 0x171   :  { %111 = vadd.xlane.f32.xlu0 %v108_v19  ;;  %109 = vadd.xlane.f32.xlu1 %v107_v20 }
 0x175   :  { %119 = vmax.xlane.f32.xlu1 %v118_v22 }
 0x1fe   :  { %v112_v23 = vpop.xlane.xlu0 %111  ;;  %v110_v24 = vpop.xlane.xlu1 %109 }
 0x1ff   :  { %v114_v26 = vcvt.f32.s32 %v112_v23  ;;  %v113_v28 = vcvt.f32.s32 %v110_v24 }
 0x201   :  { %v115_v27 = vshll.u32 %v114_v26, 16 }
 0x202   :  { %v120_v30 = vpop.xlane.xlu1 %119 }
 0x203   :  { %v116_v31 = vadd.s32 %v115_v27, %v113_v28  ;;  %vm121_vm5 = vcmp.gt.f32.partialorder %v120_v30, 0.0 }
 0x205   :  { %v122_v32 = vsel %vm121_vm5, %v116_v31, 1 }
 0x206   :  { %v126_v33 = vrot.slane %v122_v32, %v125_v29 }
 0x208   :  { %128 = vst.msk [vmem:[#allocation2] sm:$0x1] %vm127_vm6, %v126_v33 }
 0x209   :  { %171 = shalt.err (!%p168_p4)
}
 0x20a   :  { %s172_s29 = scalar_lea.hbm %s254_s5, 16 }
 0x20b   :  { %p173_p5 = scmp.ne.s32.totalorder %s254_s5, %s172_s29  ;;  %p176_p6 = scmp.lt.u32.totalorder %s172_s29, %s254_s5 }
 0x20d   :  { %p178_p7 = pnand %p176_p6, %p173_p5 }
 0x20f   :  { %181 = shalt.err (!%p178_p7)
}
 0x210   :  { %138 = dma.vmem_to_hbm [thread:$0]  %s136_s3, 16, %s254_s5, [#allocation3]  }
 0x211   :  { %182 = dma.done.wait [#allocation3], 16  }
 0x212   :  { %183 = vsyncadd [#allocation3], 4294967280 }
 0x213   :  { %142 = vsyncpa [#allocation3], 1 }

</bundles_post_ra>
